<compile_context>
chip_gen: v6e
topology: v6e:2x2x1
jax: 0.10.0
libtpu: 0.0.40
codegen_flags: <defaults>
</compile_context>

<pallas_src>
import functools
import math

import jax
import jax.numpy as jnp
from jax.experimental import pallas as pl
from jax.experimental.pallas import tpu as pltpu


def apply_weights_kernel(img_t_ref, img_f_ref, w_ref, b_ref, out_ref,
                         *, bias_coeff_true, bias_coeff_false):
    # ---- Stage 1: sublane partial sums (pure in-vreg VPU adds, no XLU) ----
    # Cast to f32 so inputs can arrive in narrower dtypes; accumulate in f32
    # (correct + fast path on v5e which has no bf16 VPU/EUP).
    pt = jnp.sum(img_t_ref[...].astype(jnp.float32), axis=0, keepdims=True)   # (1, 128)
    pf = jnp.sum(img_f_ref[...].astype(jnp.float32), axis=0, keepdims=True)   # (1, 128)
    pw = jnp.sum(w_ref[...].astype(jnp.float32), axis=0, keepdims=True)       # (1, m)
    pb = b_ref[...].astype(jnp.float32)                                        # (1, m)

    # ---- Stage 2: fused cross-lane reduction ----
    # One XLU pass over a (4, 128) stack when m == 128 (the common case here),
    # otherwise two passes grouped by lane width. Either way this replaces the
    # four serialized full reductions of the previous version.
    if pw.shape[1] == pt.shape[1]:
        stacked = jnp.concatenate([pt, pf, pw, pb], axis=0)       # (4, lanes)
        totals = jnp.sum(stacked, axis=1, keepdims=True)          # (4, 1)
        sum_t, sum_f = totals[0, 0], totals[1, 0]
        sum_w, sum_b = totals[2, 0], totals[3, 0]
    else:
        imgs = jnp.concatenate([pt, pf], axis=0)                  # (2, 128)
        wb = jnp.concatenate([pw, pb], axis=0)                    # (2, m)
        t_img = jnp.sum(imgs, axis=1, keepdims=True)
        t_wb = jnp.sum(wb, axis=1, keepdims=True)
        sum_t, sum_f = t_img[0, 0], t_img[1, 0]
        sum_w, sum_b = t_wb[0, 0], t_wb[1, 0]

    # Bias contributes P * sum(b) per image over I_pair images (closed form).
    # bias_coeff_* are exact Python floats folded at trace time.
    true_val = sum_t * sum_w + jnp.float32(bias_coeff_true) * sum_b
    false_val = sum_f * sum_w + jnp.float32(bias_coeff_false) * sum_b

    # Single lane-dense output block: lane 0 = true_sum, lane 1 = false_sum.
    lane = jax.lax.broadcasted_iota(jnp.int32, out_ref.shape, dimension=1)
    out_ref[...] = jnp.where(lane == 0, true_val,
                             jnp.where(lane == 1, false_val, jnp.float32(0.0)))


def _to_lane_dense(imgs, n_keep):
    """Flatten the first n_keep images (row-major, matching torch .view(-1))
    and reshape to a lane-dense [rows, 128] slab. Only pads to a multiple of
    128 lanes when strictly necessary (padding does not change sums); the
    sublane count need not be a multiple of 8 because the BlockSpec block
    equals the full array."""
    flat = imgs[:n_keep].reshape(-1)
    total = flat.shape[0]
    pad = (-total) % 128
    if pad:
        flat = jnp.concatenate([flat, jnp.zeros((pad,), dtype=flat.dtype)])
    return flat.reshape(-1, 128)


def apply_weights(images_true, images_false, weights, bias):
    """images_*: [I_*, *img_dims]; weights: [n, m]; bias: [m] -> (true_sum, false_sum)."""
    # zip() in the PyTorch loop truncates to the shorter list.
    n_pair = min(images_true.shape[0], images_false.shape[0])
    p_true = math.prod(images_true.shape[1:])
    p_false = math.prod(images_false.shape[1:])
    n, m = weights.shape

    img_t = _to_lane_dense(images_true, n_pair)    # [rows_t, 128]
    img_f = _to_lane_dense(images_false, n_pair)   # [rows_f, 128]
    b = bias.reshape(1, m)

    kernel = functools.partial(
        apply_weights_kernel,
        # Exact integer -> Python float (double) at trace time; single f32
        # rounding happens only where the rest of the math is f32 anyway.
        bias_coeff_true=float(n_pair * p_true),
        bias_coeff_false=float(n_pair * p_false),
    )

    # Everything fits easily in VMEM at these sizes -> one grid step, all
    # operands resident (no per-step overhead, no accumulator RMW).
    out = pl.pallas_call(
        kernel,
        out_shape=jax.ShapeDtypeStruct((1, 128), jnp.float32),
        grid_spec=pltpu.PrefetchScalarGridSpec(
            num_scalar_prefetch=0,
            grid=(1,),
            in_specs=[
                pl.BlockSpec(img_t.shape, lambda i: (0, 0)),   # true pixels, lane-dense
                pl.BlockSpec(img_f.shape, lambda i: (0, 0)),   # false pixels, lane-dense
                pl.BlockSpec((n, m), lambda i: (0, 0)),        # weights (resident)
                pl.BlockSpec((1, m), lambda i: (0, 0)),        # bias (resident)
            ],
            out_specs=pl.BlockSpec((1, 128), lambda i: (0, 0)),
        ),
        compiler_params=pltpu.CompilerParams(
            dimension_semantics=("arbitrary",)),
    )(img_t, img_f, weights, b)

    return out[0, 0], out[0, 1]


def apply_weights_ref(images_true, images_false, weights, bias):
    """Pure-JAX reference mirroring the PyTorch forward exactly (matmul form,
    including zip truncation to the shorter image list)."""
    n, m = weights.shape

    def one(img):
        x = img.reshape(-1, 1)
        x_rep = jnp.tile(x, (1, n))
        y = jnp.dot(x_rep, weights, preferred_element_type=jnp.float32,
                    precision=jax.lax.Precision.HIGHEST) + bias[None, :]
        return jnp.sum(y)

    n_pair = min(images_true.shape[0], images_false.shape[0])
    true_sum = sum(one(images_true[i]) for i in range(n_pair))
    false_sum = sum(one(images_false[i]) for i in range(n_pair))
    return true_sum, false_sum


if __name__ == "__main__":
    key = jax.random.PRNGKey(0)
    k_t, k_f, k_w, k_b = jax.random.split(key, 4)

    # Deliberately unequal image counts (zip truncates to 3 pairs), image shape
    # (4, 8, 8) -> P = 256 pixels per image; weights: [n, m].
    I_t, I_f, C, H, W = 3, 4, 4, 8, 8
    n, m = 8, 128

    images_true = jax.random.normal(k_t, (I_t, C, H, W), dtype=jnp.float32)
    images_false = jax.random.normal(k_f, (I_f, C, H, W), dtype=jnp.float32)
    weights = jax.random.normal(k_w, (n, m), dtype=jnp.float32)
    # Deterministic stand-in for the randomly-initialized bias of the Linear
    # created inside forward() (PyTorch init is nondeterministic per call).
    bias = jax.random.uniform(k_b, (m,), dtype=jnp.float32,
                              minval=-1.0 / math.sqrt(n), maxval=1.0 / math.sqrt(n))

    true_sum, false_sum = apply_weights(images_true, images_false, weights, bias)
    jax.block_until_ready((true_sum, false_sum))

    ref_true, ref_false = apply_weights_ref(images_true, images_false, weights, bias)

    def rel_err(a, b):
        return abs(float(a) - float(b)) / max(1.0, abs(float(b)))

    assert rel_err(true_sum, ref_true) < 2e-3, (true_sum, ref_true)
    assert rel_err(false_sum, ref_false) < 2e-3, (false_sum, ref_false)

    print("KERNEL_OK")
</pallas_src>

<mosaic_0001>
module attributes {stable_mosaic.version = 11 : i64} {
  func.func @apply_weights_kernel(%arg0: i32, %arg1: memref<6x128xf32, #tpu.memory_space<vmem>>, %arg2: memref<6x128xf32, #tpu.memory_space<vmem>>, %arg3: memref<8x128xf32, #tpu.memory_space<vmem>>, %arg4: memref<1x128xf32, #tpu.memory_space<vmem>>, %arg5: memref<1x128xf32, #tpu.memory_space<vmem>>) attributes {dimension_semantics = [#tpu.dimension_semantics<arbitrary>], iteration_bounds = array<i64: 1>, scalar_prefetch = 0 : i64, scratch_operands = 0 : i64, tpu.core_type = #tpu.core_type<tc>, window_params = [{pipeline_mode = #tpu.pipeline_mode<synchronous>, transform_indices = @transform_0, window_bounds = array<i64: 6, 128>}, {pipeline_mode = #tpu.pipeline_mode<synchronous>, transform_indices = @transform_1, window_bounds = array<i64: 6, 128>}, {pipeline_mode = #tpu.pipeline_mode<synchronous>, transform_indices = @transform_2, window_bounds = array<i64: 8, 128>}, {pipeline_mode = #tpu.pipeline_mode<synchronous>, transform_indices = @transform_3, window_bounds = array<i64: 1, 128>}, {pipeline_mode = #tpu.pipeline_mode<synchronous>, transform_indices = @transform_4, window_bounds = array<i64: 1, 128>}]} {
    %c0 = arith.constant 0 : index
    %c0_0 = arith.constant 0 : index
    %0 = vector.load %arg1[%c0, %c0_0] : memref<6x128xf32, #tpu.memory_space<vmem>>, vector<6x128xf32>
    %cst = arith.constant dense<0.000000e+00> : vector<128xf32>
    %1 = vector.multi_reduction <add>, %0, %cst [0] : vector<6x128xf32> to vector<128xf32>
    %2 = vector.shape_cast %1 : vector<128xf32> to vector<1x128xf32>
    %c0_1 = arith.constant 0 : index
    %c0_2 = arith.constant 0 : index
    %3 = vector.load %arg2[%c0_1, %c0_2] : memref<6x128xf32, #tpu.memory_space<vmem>>, vector<6x128xf32>
    %cst_3 = arith.constant dense<0.000000e+00> : vector<128xf32>
    %4 = vector.multi_reduction <add>, %3, %cst_3 [0] : vector<6x128xf32> to vector<128xf32>
    %5 = vector.shape_cast %4 : vector<128xf32> to vector<1x128xf32>
    %c0_4 = arith.constant 0 : index
    %c0_5 = arith.constant 0 : index
    %6 = vector.load %arg3[%c0_4, %c0_5] : memref<8x128xf32, #tpu.memory_space<vmem>>, vector<8x128xf32>
    %cst_6 = arith.constant dense<0.000000e+00> : vector<128xf32>
    %7 = vector.multi_reduction <add>, %6, %cst_6 [0] : vector<8x128xf32> to vector<128xf32>
    %8 = vector.shape_cast %7 : vector<128xf32> to vector<1x128xf32>
    %c0_7 = arith.constant 0 : index
    %c0_8 = arith.constant 0 : index
    %9 = vector.load %arg4[%c0_7, %c0_8] : memref<1x128xf32, #tpu.memory_space<vmem>>, vector<1x128xf32>
    %10 = tpu.concatenate %2, %5, %8, %9 in 0 : vector<1x128xf32>, vector<1x128xf32>, vector<1x128xf32>, vector<1x128xf32> -> vector<4x128xf32>
    %cst_9 = arith.constant dense<0.000000e+00> : vector<4xf32>
    %11 = vector.multi_reduction <add>, %10, %cst_9 [1] : vector<4x128xf32> to vector<4xf32>
    %12 = vector.shape_cast %11 : vector<4xf32> to vector<4x1xf32>
    %13 = vector.extract_strided_slice %12 {offsets = [0, 0], sizes = [1, 1], strides = [1, 1]} : vector<4x1xf32> to vector<1x1xf32>
    %14 = vector.extract %13[0, 0] : f32 from vector<1x1xf32>
    %15 = vector.extract_strided_slice %12 {offsets = [1, 0], sizes = [1, 1], strides = [1, 1]} : vector<4x1xf32> to vector<1x1xf32>
    %16 = vector.extract %15[0, 0] : f32 from vector<1x1xf32>
    %17 = vector.extract_strided_slice %12 {offsets = [2, 0], sizes = [1, 1], strides = [1, 1]} : vector<4x1xf32> to vector<1x1xf32>
    %18 = vector.extract %17[0, 0] : f32 from vector<1x1xf32>
    %19 = vector.extract_strided_slice %12 {offsets = [3, 0], sizes = [1, 1], strides = [1, 1]} : vector<4x1xf32> to vector<1x1xf32>
    %20 = vector.extract %19[0, 0] : f32 from vector<1x1xf32>
    %21 = arith.mulf %14, %18 : f32
    %cst_10 = arith.constant 7.680000e+02 : f32
    %22 = arith.mulf %cst_10, %20 : f32
    %23 = arith.addf %21, %22 : f32
    %24 = arith.mulf %16, %18 : f32
    %cst_11 = arith.constant 7.680000e+02 : f32
    %25 = arith.mulf %cst_11, %20 : f32
    %26 = arith.addf %24, %25 : f32
    %27 = tpu.iota {dimensions = array<i32: 1>} : vector<1x128xi32>
    %c0_i32 = arith.constant 0 : i32
    %28 = vector.broadcast %c0_i32 : i32 to vector<1x128xi32>
    %29 = arith.cmpi eq, %27, %28 : vector<1x128xi32>
    %c1_i32 = arith.constant 1 : i32
    %30 = vector.broadcast %c1_i32 : i32 to vector<1x128xi32>
    %31 = arith.cmpi eq, %27, %30 : vector<1x128xi32>
    %cst_12 = arith.constant 0.000000e+00 : f32
    %32 = vector.broadcast %26 : f32 to vector<1x128xf32>
    %33 = vector.broadcast %cst_12 : f32 to vector<1x128xf32>
    %34 = arith.select %31, %32, %33 : vector<1x128xi1>, vector<1x128xf32>
    %35 = vector.broadcast %23 : f32 to vector<1x128xf32>
    %36 = arith.select %29, %35, %34 : vector<1x128xi1>, vector<1x128xf32>
    %c0_13 = arith.constant 0 : index
    %c0_14 = arith.constant 0 : index
    %37 = vector.load %arg5[%c0_13, %c0_14] : memref<1x128xf32, #tpu.memory_space<vmem>>, vector<1x128xf32>
    tpu.vector_store %arg5[%c0_13, %c0_14], %36 {strides = array<i32>} : memref<1x128xf32, #tpu.memory_space<vmem>>, vector<1x128xf32>,
    return
  }
  func.func @transform_0(%arg0: i32) -> (i32, i32) {
    %c0_i32 = arith.constant 0 : i32
    %c0_i32_0 = arith.constant 0 : i32
    %c0_i32_1 = arith.constant 0 : i32
    return %c0_i32, %c0_i32_0 : i32, i32
  }
  func.func @transform_1(%arg0: i32) -> (i32, i32) {
    %c0_i32 = arith.constant 0 : i32
    %c0_i32_0 = arith.constant 0 : i32
    %c0_i32_1 = arith.constant 0 : i32
    return %c0_i32, %c0_i32_0 : i32, i32
  }
  func.func @transform_2(%arg0: i32) -> (i32, i32) {
    %c0_i32 = arith.constant 0 : i32
    %c0_i32_0 = arith.constant 0 : i32
    %c0_i32_1 = arith.constant 0 : i32
    return %c0_i32, %c0_i32_0 : i32, i32
  }
  func.func @transform_3(%arg0: i32) -> (i32, i32) {
    %c0_i32 = arith.constant 0 : i32
    %c0_i32_0 = arith.constant 0 : i32
    %c0_i32_1 = arith.constant 0 : i32
    return %c0_i32, %c0_i32_0 : i32, i32
  }
  func.func @transform_4(%arg0: i32) -> (i32, i32) {
    %c0_i32 = arith.constant 0 : i32
    %c0_i32_0 = arith.constant 0 : i32
    %c0_i32_1 = arith.constant 0 : i32
    return %c0_i32, %c0_i32_0 : i32, i32
  }
}

</mosaic_0001>

<bundles_post_ra>
// kernel: tpu_custom_call.1
= control target key start
LH: loop header
LB: loop body
LE: loop exit
PB: predicated region body
PF: predicated region fallthrough
CT: control target
= control target key end

     0   :  { %9 = vsyncpa [#allocation3], 0  ;;  %s274_s0 = inlined_call_operand.hbm [shape: f32[6,128], index: 0, kind: input, shape index: {}]   ;;  %s275_s1 = inlined_call_operand.hbm [shape: f32[6,128], index: 1, kind: input, shape index: {}]   ;;  %s276_s2 = inlined_call_operand.hbm [shape: f32[8,128], index: 2, kind: input, shape index: {}]   ;;  %s277_s3 = inlined_call_operand.vmem [shape: f32[1,128], index: 3, kind: input, shape index: {}]   ;;  %s278_s4 = inlined_call_operand.hbm [shape: f32[1,128], index: 4, kind: output, shape index: {}]  }
   0x1   :  { %10 = vsyncpa [#allocation6], 0 }
   0x2   :  { %11 = vsyncpa [#allocation4], 0  ;;  %s230_s15 = smov [#allocation5]   ;;  %s231_s17 = smov [#allocation2]  }
   0x3   :  { %s28_s16 = sshll.u32 %s230_s15, 4  ;;  %s18_s18 = sshll.u32 %s231_s17, 4  ;;  %s29_s16 = int_to_ptr.vmem [resolvable:$true] %s28_s16  ;;  %s19_s18 = int_to_ptr.vmem [resolvable:$true] %s18_s18 }
   0x4   :  { %s152_s19 = scalar_lea.vmem %s29_s16, 128  ;;  %p157_p1 = scmp.lt.s32.totalorder %s29_s16, %s29_s16 }
   0x5   :  { %p153_p0 = scmp.ne.s32.totalorder %s29_s16, %s152_s19  ;;  %p158_p2 = scmp.lt.s32.totalorder %s152_s19, %s152_s19 }
   0x7   :  { %p159_p3 = por %p158_p2, %p157_p1 }
   0x9   :  { %p160_p4 = pnand %p159_p3, %p153_p0 }
   0xb   :  { %163 = shalt.err (!%p160_p4)
}
   0xc   :  { %31 = dma.hbm_to_vmem [thread:$0]  %s275_s1, 128, %s29_s16, [#allocation6]  }
   0xd   :  { %s172_s22 = scalar_lea.vmem %s19_s18, 128  ;;  %p177_p6 = scmp.lt.s32.totalorder %s19_s18, %s19_s18 }
   0xe   :  { %p173_p5 = scmp.ne.s32.totalorder %s19_s18, %s172_s22  ;;  %p178_p7 = scmp.lt.s32.totalorder %s172_s22, %s172_s22 }
  0x10   :  { %p179_p8 = por %p178_p7, %p177_p6 }
  0x12   :  { %p180_p9 = pnand %p179_p8, %p173_p5 }
  0x14   :  { %183 = shalt.err (!%p180_p9)
}
  0x15   :  { %21 = dma.hbm_to_vmem [thread:$0]  %s274_s0, 128, %s19_s18, [#allocation3]  }
  0x16   :  { %s232_s25 = smov [#allocation7]  }
  0x17   :  { %s38_s26 = sshll.u32 %s232_s25, 4  ;;  %s39_s26 = int_to_ptr.vmem [resolvable:$true] %s38_s26 }
  0x18   :  { %s192_s27 = scalar_lea.vmem %s39_s26, 128  ;;  %p197_p11 = scmp.lt.s32.totalorder %s39_s26, %s39_s26 }
  0x19   :  { %p193_p10 = scmp.ne.s32.totalorder %s39_s26, %s192_s27  ;;  %p198_p12 = scmp.lt.s32.totalorder %s192_s27, %s192_s27 }
  0x1b   :  { %p199_p13 = por %p198_p12, %p197_p11 }
  0x1d   :  { %p200_p0 = pnand %p199_p13, %p193_p10 }
  0x1f   :  { %203 = shalt.err (!%p200_p0)
}
  0x20   :  { %41 = dma.hbm_to_vmem [thread:$0]  %s276_s2, 128, %s39_s26, [#allocation6]  }
  0x21   :  { %224 = dma.done.wait [#allocation3], 128  }
  0x22   :  { %225 = vsyncadd [#allocation3], 4294967168 }
  0x23   :  { %226 = dma.done.wait [#allocation6], 256  }
  0x24   :  { %227 = vsyncadd [#allocation6], 4294967040  ;;  %vm54_vm0 = vcmask 1045504   ;;  %v53_v0 = vld [vmem:[#allocation2] sm:$0x3f]  ;;  %v70_v2 = vld [vmem:[#allocation7] sm:$0xff]  ;;  %v106_v32 = vlaneseq }
  0x25   :  { %v62_v1 = vld [vmem:[#allocation5] sm:$0x3f]  ;;  %v55_v3 = vsel %vm54_vm0, %v53_v0, 0.0  ;;  %v71_v5 = vrot.slane %v70_v2, 4  ;;  %vm84_vm1 = vcmask 1040384   ;;  %vm86_vm2 = vcmask 1041408  }
  0x26   :  { %v63_v4 = vsel %vm54_vm0, %v62_v1, 0.0  ;;  %v56_v6 = vrot.slane %v55_v3, 4  ;;  %v131_v23 = vld [vmem:[%s277_s3] ss:$0 sm:$0xff]  ;;  %vm88_vm3 = vcmask 1042432   ;;  %vm90_vm4 = vcmask 1043456  }
  0x27   :  { %v64_v7 = vrot.slane %v63_v4, 4  ;;  %v72_v8 = vadd.f32 %v71_v5, %v70_v2  ;;  %v107_v33 = vand.u32 127, %v106_v32  ;;  %s233_s11 = smov [#allocation8]  }
  0x28   :  { %v57_v9 = vadd.f32 %v56_v6, %v55_v3  ;;  %s121_s12 = sshll.u32 %s233_s11, 4  ;;  %s122_s12 = int_to_ptr.vmem [resolvable:$true] %s121_s12 }
  0x29   :  { %v65_v10 = vadd.f32 %v64_v7, %v63_v4  ;;  %v73_v11 = vrot.slane %v72_v8, 2  ;;  %vm109_vm5 = vcmp.eq.s32.totalorder %v107_v33, 1  ;;  %vm108_vm6 = vcmp.eq.s32.totalorder %v107_v33, 0  ;;  %s204_s13 = scalar_lea.vmem %s122_s12, 16  ;;  %s208_s14 = scalar_lea.vmem %s122_s12, 32 }
  0x2a   :  { %v58_v12 = vrot.slane %v57_v9, 2  ;;  %p205_p1 = scmp.ne.s32.totalorder %s122_s12, %s204_s13  ;;  %p209_p2 = scmp.lt.s32.totalorder %s122_s12, %s122_s12 }
  0x2b   :  { %v66_v13 = vrot.slane %v65_v10, 2  ;;  %v74_v14 = vadd.f32 %v73_v11, %v72_v8  ;;  %p210_p3 = scmp.lt.s32.totalorder %s208_s14, %s204_s13 }
  0x2c   :  { %v59_v15 = vadd.f32 %v58_v12, %v57_v9 }
  0x2d   :  { %v67_v16 = vadd.f32 %v66_v13, %v65_v10  ;;  %v75_v17 = vrot.slane %v74_v14, 1  ;;  %p211_p4 = por %p210_p3, %p209_p2 }
  0x2e   :  { %v60_v18 = vrot.slane %v59_v15, 1 }
  0x2f   :  { %v68_v19 = vrot.slane %v67_v16, 1  ;;  %v76_v20 = vadd.f32 %v75_v17, %v74_v14  ;;  %p212_p5 = pnand %p211_p4, %p205_p1 }
  0x30   :  { %v61_v21 = vadd.f32 %v60_v18, %v59_v15 }
  0x31   :  { %v69_v22 = vadd.f32 %v68_v19, %v67_v16 }
  0x33   :  { %v85_v24 = vsel %vm84_vm1, %v61_v21, %v69_v22 }
  0x34   :  { %v87_v25 = vsel %vm86_vm2, %v85_v24, %v76_v20 }
  0x35   :  { %v89_v26 = vsel %vm88_vm3, %v87_v25, %v131_v23 }
  0x36   :  { %v91_v27 = vsel %vm90_vm4, %v89_v26, 0.0 }
  0x37   :  { %92 = vadd.xlane.f32.xlu0 %v91_v27 }
  0xc0   :  { %v93_v28 = vpop.xlane.xlu0 %92 }
  0xc1   :  { %132 = vpush %v93_v28  ;;  %v95_v29 = vrot.slane %v93_v28, 1  ;;  %v97_v30 = vrot.slane %v93_v28, 2  ;;  %v99_v31 = vrot.slane %v93_v28, 3 }
  0xc3   :  { %134 = vpush %v95_v29 }
  0xc4   :  { %136 = vpush %v97_v30 }
  0xc5   :  { %138 = vpush %v99_v31 }
  0xf2   :  { %s133_s29 = spop %132 }
  0xf4   :  { %s135_s30 = spop %134 }
  0xf5   :  { %s137_s5 = spop %136 }
  0xf6   :  { %s101_s3 = smul.f32 %s137_s5, %s133_s29  ;;  %s139_s6 = spop %138 }
  0xf7   :  { %s104_s7 = smul.f32 %s137_s5, %s135_s30 }
  0xf8   :  { %s102_s8 = smul.f32 768.0, %s139_s6 }
  0xfa   :  { %s103_s9 = sadd.f32 %s102_s8, %s101_s3 }
  0xfb   :  { %s105_s10 = sadd.f32 %s104_s7, %s102_s8 }
  0xfc   :  { %v112_v34 = vstv %s103_s9 }
  0xfd   :  { %v110_v35 = vstv %s105_s10 }
  0xfe   :  { %v111_v36 = vsel %vm109_vm5, %v110_v35, 0.0 }
  0xff   :  { %v113_v37 = vsel %vm108_vm6, %v112_v34, %v111_v36 }
 0x100   :  { %114 = vst [vmem:[#allocation8] sm:$0x1] %v113_v37 }
 0x101   :  { %215 = shalt.err (!%p212_p5)
}
 0x102   :  { %124 = dma.vmem_to_hbm [thread:$0]  %s122_s12, 16, %s278_s4, [#allocation4]  }
 0x103   :  { %228 = dma.done.wait [#allocation4], 16  }
 0x104   :  { %229 = vsyncadd [#allocation4], 4294967280 }
 0x105   :  { %128 = vsyncpa [#allocation3], 1 }
 0x106   :  { %129 = vsyncpa [#allocation6], 1 }
 0x107   :  { %130 = vsyncpa [#allocation4], 1 }

</bundles_post_ra>
